<compile_context>
chip_gen: v5e
topology: v5e:2x2
jax: 0.10.0
libtpu: 0.0.40
codegen_flags: <defaults>
</compile_context>

<pallas_src>
import functools

import jax
import jax.numpy as jnp
from jax.experimental import pallas as pl
from jax.experimental.pallas import tpu as pltpu

LANE = 128       # vreg / MXU lane width
BF16_SUB = 16    # bf16 sublane packing (16 rows per vreg)


def _round_up(x, m):
    return (x + m - 1) // m * m


def _vmem_limit_bytes(need_bytes):
    """Per-generation VMEM limit: actual need + headroom, clamped to the chip."""
    try:
        cap = int(pltpu.get_tpu_info().vmem_capacity_bytes)
    except Exception:
        cap = 64 << 20                       # conservative fallback (v7x size)
    limit = max(int(need_bytes) + (8 << 20), 32 << 20)   # Mosaic scratch headroom
    return int(min(limit, int(cap * 0.8)))   # ~100 MiB on v5e/v6e, ~51 MiB on v7x


# ----------------------------------------------------------------------------
# Kernels
# ----------------------------------------------------------------------------
def _conv_folded_kernel(x_ref, w_ref, o_ref):
    """Small-Cin path: taps folded into K -> one MXU matmul per grid step.

    x_ref: (1, TH, OW_p, K_p)   im2col patches (bf16), K_p = rup(KH*KW*Cin, 128)
    w_ref: (K_p, TCOUT)         folded weight tile (bf16)
    o_ref: (1, TH, OW_p, TCOUT) lane-dense output tile
    """
    _, th, ow, kp = x_ref.shape
    tco = o_ref.shape[-1]
    patch = x_ref[0].reshape(th * ow, kp)      # layout-preserving: ow % 16 == 0
    acc = jnp.dot(patch, w_ref[...], preferred_element_type=jnp.float32)
    o_ref[0] = acc.reshape(th, ow, tco).astype(o_ref.dtype)


def _conv_taps_kernel(x_ref, w_ref, o_ref, acc_ref, *, TH, OW, KH, KW):
    """Large-Cin path: per-tap shift-and-accumulate matmuls (1x HBM traffic).

    x_ref:   (1, Hp, Wp, Cin_p)     whole padded image for batch n (bf16)
    w_ref:   (KH*KW, Cin_p, TCOUT)  weight taps (bf16)
    o_ref:   (1, TH, OW_p, TCOUT)   lane-dense output tile
    acc_ref: (TH*OW_p, TCOUT) f32   VMEM accumulator (no vreg spills at big M)
    """
    h = pl.program_id(2)
    oh0 = pl.multiple_of(h * TH, 8) if TH % 8 == 0 else h * TH
    cin_p = x_ref.shape[-1]
    tco = o_ref.shape[-1]
    thk = TH + KH - 1
    m = TH * OW

    for dw in range(KW):
        # One window per dw, reused by all KH row taps: KW-1 unaligned sublane
        # loads per grid step instead of KH*(KW-1) unaligned patch slices.
        # TODO(synk): pltpu.roll along the sublane axis would move this shift
        #             onto the XLU instead of a relayout copy.
        win = x_ref[0, pl.ds(oh0, thk), pl.ds(dw, OW), :]     # (thk, OW, Cin_p)
        acc_dw = None
        for dh in range(KH):
            patch = win[dh:dh + TH].reshape(m, cin_p)   # free leading-dim slice
            d = jnp.dot(patch, w_ref[dh * KW + dw],
                        preferred_element_type=jnp.float32)
            acc_dw = d if acc_dw is None else acc_dw + d   # f32 chain (MRB-able)
        if dw == 0:
            acc_ref[...] = acc_dw                           # doubles as init
        else:
            acc_ref[...] += acc_dw
    o_ref[0] = acc_ref[...].reshape(TH, OW, tco).astype(o_ref.dtype)


# ----------------------------------------------------------------------------
# pallas_call builders
# ----------------------------------------------------------------------------
def _conv_folded_call(patches, wmat, *, TH, OH_p, OW_p, K_p, Cout_p, TCOUT,
                      out_dtype, flops):
    N = patches.shape[0]
    n_h, n_co = OH_p // TH, Cout_p // TCOUT
    cd_i = patches.dtype.itemsize
    out_i = jnp.dtype(out_dtype).itemsize
    M = TH * OW_p

    x_blk = TH * OW_p * K_p * cd_i
    w_blk = K_p * TCOUT * cd_i
    o_blk = M * TCOUT * out_i
    vmem_limit = _vmem_limit_bytes(2 * (x_blk + w_blk + o_blk))

    cost = pl.CostEstimate(
        flops=int(flops), transcendentals=0,
        bytes_accessed=int(patches.size * cd_i + wmat.size * cd_i
                           + N * OH_p * OW_p * Cout_p * out_i))

    return pl.pallas_call(
        _conv_folded_kernel,
        out_shape=jax.ShapeDtypeStruct((N, OH_p, OW_p, Cout_p), out_dtype),
        grid_spec=pltpu.PrefetchScalarGridSpec(
            num_scalar_prefetch=0,
            grid=(N, n_co, n_h),          # h innermost: weight reused across h
            in_specs=[
                pl.BlockSpec((1, TH, OW_p, K_p), lambda n, co, h: (n, h, 0, 0)),
                pl.BlockSpec((K_p, TCOUT), lambda n, co, h: (0, co)),
            ],
            out_specs=pl.BlockSpec((1, TH, OW_p, TCOUT),
                                   lambda n, co, h: (n, h, 0, co)),
        ),
        compiler_params=pltpu.CompilerParams(
            dimension_semantics=("parallel", "parallel", "parallel"),
            vmem_limit_bytes=vmem_limit),
        cost_estimate=cost,
    )(patches, wmat)


def _conv_taps_call(xpad, wtaps, *, TH, OH_p, OW_p, Cout_p, TCOUT, KH, KW,
                    out_dtype, flops, single_buffer_invariant=True):
    N, Hp, Wp, Cin_p = xpad.shape
    n_h, n_co = OH_p // TH, Cout_p // TCOUT
    cd_i = xpad.dtype.itemsize
    out_i = jnp.dtype(out_dtype).itemsize
    M = TH * OW_p

    kernel = functools.partial(_conv_taps_kernel, TH=TH, OW=OW_p, KH=KH, KW=KW)

    def run(single):
        def spec(shape, imap, invariant):
            if single and invariant:
                # Grid-invariant block: one VMEM buffer instead of two.
                return pl.BlockSpec(shape, imap, pipeline_mode=pl.Buffered(1))
            return pl.BlockSpec(shape, imap)

        x_bufs = 1 if single else 2
        w_bufs = 1 if (single and n_co == 1) else 2
        x_blk = Hp * Wp * Cin_p * cd_i
        w_blk = KH * KW * Cin_p * TCOUT * cd_i
        o_blk = M * TCOUT * out_i
        vmem_need = x_bufs * x_blk + w_bufs * w_blk + 2 * o_blk + M * TCOUT * 4
        vmem_limit = _vmem_limit_bytes(vmem_need)

        cost = pl.CostEstimate(
            flops=int(flops), transcendentals=0,
            bytes_accessed=int(xpad.size * cd_i + wtaps.size * cd_i
                               + N * OH_p * OW_p * Cout_p * out_i))

        return pl.pallas_call(
            kernel,
            out_shape=jax.ShapeDtypeStruct((N, OH_p, OW_p, Cout_p), out_dtype),
            grid_spec=pltpu.PrefetchScalarGridSpec(
                num_scalar_prefetch=0,
                grid=(N, n_co, n_h),     # h innermost: image + weight resident
                in_specs=[
                    # Whole padded image per n; block index constant over (co,h).
                    # TODO(synk): for very large feature maps (v7x 64 MiB VMEM)
                    # switch to memory_space=pl.ANY + manually double-buffered
                    # (TH+KH-1)-row slabs via make_async_copy.
                    spec((1, Hp, Wp, Cin_p), lambda n, co, h: (n, 0, 0, 0), True),
                    # Weight taps; constant over h (and over co when n_co == 1).
                    spec((KH * KW, Cin_p, TCOUT), lambda n, co, h: (0, 0, co),
                         n_co == 1),
                ],
                out_specs=pl.BlockSpec((1, TH, OW_p, TCOUT),
                                       lambda n, co, h: (n, h, 0, co)),
                scratch_shapes=[pltpu.VMEM((M, TCOUT), jnp.float32)],
            ),
            compiler_params=pltpu.CompilerParams(
                dimension_semantics=("parallel", "parallel", "parallel"),
                vmem_limit_bytes=vmem_limit),
            cost_estimate=cost,
        )(xpad, wtaps)

    if single_buffer_invariant:
        try:
            return run(True)
        except Exception:
            # pipeline_mode=pl.Buffered(1) unsupported on this jax/Mosaic
            # version -> fall back to default double buffering.
            pass
    return run(False)


# ----------------------------------------------------------------------------
# Wrappers
# ----------------------------------------------------------------------------
def conv_layer_forward_nhwc(x_nhwc, weight_oihw, *, stride=1, padding=0,
                            compute_dtype=jnp.bfloat16, out_dtype=None):
    """ConvLayer.forward (default config) on NHWC activations -> NHWC output.

    Equivalent to nn.Conv2d(Cin, Cout, (KH, KW), stride=1, padding, bias=False).
    bf16 MXU operands, f32 accumulation.
    """
    assert stride == 1, "ConvLayer default stride=1"  # TODO(synk): strided conv
    N, H, W, Cin = x_nhwc.shape
    Cout, Cin_w, KH, KW = weight_oihw.shape
    assert Cin == Cin_w
    if out_dtype is None:
        out_dtype = x_nhwc.dtype    # pass bf16 to halve HBM writeback (v5e)

    OH = H + 2 * padding - KH + 1
    OW = W + 2 * padding - KW + 1
    assert OH > 0 and OW > 0

    # --- tiling -------------------------------------------------------------
    OW_p = _round_up(OW, BF16_SUB)                    # sublane-aligned width
    TH = max(8, _round_up(max(1, 256 // OW_p), 8))    # ~256 MXU rows per dot
    TH = min(TH, _round_up(OH, 8))
    OH_p = _round_up(OH, TH)

    Cout_p = _round_up(Cout, LANE)
    TCOUT = LANE if Cout_p <= LANE else 2 * LANE      # native MXU width v6e/v7x
    Cout_p = _round_up(Cout_p, TCOUT)

    x = x_nhwc.astype(compute_dtype)
    w_hwio = jnp.transpose(weight_oihw, (2, 3, 1, 0)).astype(compute_dtype)
    flops = 2 * N * OH * OW * KH * KW * Cin * Cout

    if KH * KW * Cin <= LANE:
        # Fold every tap into K: same HBM bytes as padding Cin to 128 lanes,
        # but 1 matmul per tile instead of KH*KW and no unaligned slices.
        K = KH * KW * Cin
        K_p = _round_up(K, LANE)
        xpad = jnp.pad(x, ((0, 0), (padding, padding), (padding, padding), (0, 0)))
        cols = [xpad[:, dh:dh + OH, dw:dw + OW, :]
                for dh in range(KH) for dw in range(KW)]
        patches = jnp.concatenate(cols, axis=-1)                     # (N,OH,OW,K)
        patches = jnp.pad(patches, ((0, 0), (0, OH_p - OH),
                                    (0, OW_p - OW), (0, K_p - K)))
        wmat = jnp.pad(w_hwio.reshape(K, Cout),
                       ((0, K_p - K), (0, Cout_p - Cout)))
        out = _conv_folded_call(patches, wmat, TH=TH, OH_p=OH_p, OW_p=OW_p,
                                K_p=K_p, Cout_p=Cout_p, TCOUT=TCOUT,
                                out_dtype=out_dtype, flops=flops)
    else:
        Cin_p = _round_up(Cin, LANE)
        Hp = OH_p + KH - 1
        Wp = _round_up(OW_p + KW - 1, BF16_SUB)       # exact VMEM accounting
        xpad = jnp.pad(x, ((0, 0),
                           (padding, Hp - H - padding),
                           (padding, Wp - W - padding),
                           (0, Cin_p - Cin)))
        wtaps = jnp.pad(w_hwio.reshape(KH * KW, Cin, Cout),
                        ((0, 0), (0, Cin_p - Cin), (0, Cout_p - Cout)))
        out = _conv_taps_call(xpad, wtaps, TH=TH, OH_p=OH_p, OW_p=OW_p,
                              Cout_p=Cout_p, TCOUT=TCOUT, KH=KH, KW=KW,
                              out_dtype=out_dtype, flops=flops)

    return out[:, :OH, :OW, :Cout]


def conv_layer_forward(x_nchw, weight_oihw, *, stride=1, padding=0,
                       compute_dtype=jnp.bfloat16, out_dtype=None):
    """ConvLayer.forward with the module's NCHW interface."""
    # NOTE: when chaining ConvLayers prefer conv_layer_forward_nhwc to avoid
    # the NCHW<->NHWC relayout round trips (they dominate on v5e HBM).
    x_nhwc = jnp.transpose(x_nchw, (0, 2, 3, 1))
    out = conv_layer_forward_nhwc(x_nhwc, weight_oihw, stride=stride,
                                  padding=padding, compute_dtype=compute_dtype,
                                  out_dtype=out_dtype)
    return jnp.transpose(out, (0, 3, 1, 2))


# ----------------------------------------------------------------------------
# Self-test
# ----------------------------------------------------------------------------
if __name__ == "__main__":
    key = jax.random.PRNGKey(0)
    kx, kw, kx2, kw2 = jax.random.split(key, 4)

    # Case 1 (module defaults): batch=2, in_planes=4, out_planes=8, 16x16,
    # kernel_size=3, stride=1, padding=0  ->  folded (im2col) path.
    N, Cin, H, W = 2, 4, 16, 16
    Cout, KH, KW = 8, 3, 3
    x = jax.random.normal(kx, (N, Cin, H, W), dtype=jnp.float32)
    fan_in = Cin * KH * KW
    w = jax.random.uniform(kw, (Cout, Cin, KH, KW), dtype=jnp.float32,
                           minval=-(fan_in ** -0.5), maxval=fan_in ** -0.5)

    out = jax.block_until_ready(conv_layer_forward(x, w, stride=1, padding=0))
    assert out.shape == (N, Cout, H - KH + 1, W - KW + 1)

    ref16 = jax.lax.conv_general_dilated(
        x.astype(jnp.bfloat16), w.astype(jnp.bfloat16), (1, 1), "VALID",
        dimension_numbers=("NCHW", "OIHW", "NCHW"),
        preferred_element_type=jnp.float32)
    assert jnp.allclose(out.astype(jnp.float32), ref16, atol=1e-2, rtol=1e-2)
    ref32 = jax.lax.conv_general_dilated(
        x, w, (1, 1), "VALID", dimension_numbers=("NCHW", "OIHW", "NCHW"))
    assert jnp.allclose(out.astype(jnp.float32), ref32, atol=5e-2, rtol=5e-2)

    # Case 2: larger channel count + padding=1 -> per-tap (Cin_p=128) path.
    N2, Cin2, H2, W2, Cout2 = 2, 32, 12, 12, 40
    x2 = jax.random.normal(kx2, (N2, Cin2, H2, W2), dtype=jnp.float32)
    fan_in2 = Cin2 * KH * KW
    w2 = jax.random.uniform(kw2, (Cout2, Cin2, KH, KW), dtype=jnp.float32,
                            minval=-(fan_in2 ** -0.5), maxval=fan_in2 ** -0.5)

    out2 = jax.block_until_ready(conv_layer_forward(x2, w2, stride=1, padding=1))
    assert out2.shape == (N2, Cout2, H2, W2)

    ref2_16 = jax.lax.conv_general_dilated(
        x2.astype(jnp.bfloat16), w2.astype(jnp.bfloat16), (1, 1),
        [(1, 1), (1, 1)], dimension_numbers=("NCHW", "OIHW", "NCHW"),
        preferred_element_type=jnp.float32)
    assert jnp.allclose(out2.astype(jnp.float32), ref2_16, atol=1e-2, rtol=1e-2)
    ref2_32 = jax.lax.conv_general_dilated(
        x2, w2, (1, 1), [(1, 1), (1, 1)],
        dimension_numbers=("NCHW", "OIHW", "NCHW"))
    assert jnp.allclose(out2.astype(jnp.float32), ref2_32, atol=5e-2, rtol=5e-2)

    print("KERNEL_OK")
</pallas_src>

<mosaic_0001>
module attributes {stable_mosaic.version = 11 : i64} {
  func.func @_conv_folded_kernel(%arg0: i32, %arg1: i32, %arg2: i32, %arg3: memref<1x16x16x128xbf16, #tpu.memory_space<vmem>>, %arg4: memref<128x128xbf16, #tpu.memory_space<vmem>>, %arg5: memref<1x16x16x128xf32, #tpu.memory_space<vmem>>) attributes {dimension_semantics = [#tpu.dimension_semantics<parallel>, #tpu.dimension_semantics<parallel>, #tpu.dimension_semantics<parallel>], iteration_bounds = array<i64: 2, 1, 1>, scalar_prefetch = 0 : i64, scratch_operands = 0 : i64, tpu.core_type = #tpu.core_type<tc>, window_params = [{transform_indices = @transform_0, window_bounds = array<i64: 1, 16, 16, 128>}, {transform_indices = @transform_1, window_bounds = array<i64: 128, 128>}, {transform_indices = @transform_2, window_bounds = array<i64: 1, 16, 16, 128>}]} {
    %c0 = arith.constant 0 : index
    %c0_0 = arith.constant 0 : index
    %c0_1 = arith.constant 0 : index
    %c0_2 = arith.constant 0 : index
    %0 = vector.load %arg3[%c0, %c0_0, %c0_1, %c0_2] : memref<1x16x16x128xbf16, #tpu.memory_space<vmem>>, vector<1x16x16x128xbf16>
    %1 = vector.shape_cast %0 : vector<1x16x16x128xbf16> to vector<16x16x128xbf16>
    %2 = vector.shape_cast %1 : vector<16x16x128xbf16> to vector<256x128xbf16>
    %c0_3 = arith.constant 0 : index
    %c0_4 = arith.constant 0 : index
    %3 = vector.load %arg4[%c0_3, %c0_4] : memref<128x128xbf16, #tpu.memory_space<vmem>>, vector<128x128xbf16>
    %cst = arith.constant dense<0.000000e+00> : vector<256x128xf32>
    %4 = tpu.matmul %2, %3, %cst {dimension_numbers = #tpu.dot_dimension_numbers<[1], [0], [0], [1], [0, 0, 1, 1], [], []>} : vector<256x128xbf16>, vector<128x128xbf16>, vector<256x128xf32> -> vector<256x128xf32>
    %5 = vector.shape_cast %4 : vector<256x128xf32> to vector<16x16x128xf32>
    %c0_5 = arith.constant 0 : index
    %c0_6 = arith.constant 0 : index
    %c0_7 = arith.constant 0 : index
    %c0_8 = arith.constant 0 : index
    %6 = vector.load %arg5[%c0_5, %c0_6, %c0_7, %c0_8] : memref<1x16x16x128xf32, #tpu.memory_space<vmem>>, vector<1x16x16x128xf32>
    %7 = vector.shape_cast %6 : vector<1x16x16x128xf32> to vector<16x16x128xf32>
    %8 = vector.shape_cast %5 : vector<16x16x128xf32> to vector<1x16x16x128xf32>
    tpu.vector_store %arg5[%c0_5, %c0_6, %c0_7, %c0_8], %8 {strides = array<i32>} : memref<1x16x16x128xf32, #tpu.memory_space<vmem>>, vector<1x16x16x128xf32>,
    return
  }
  func.func @transform_0(%arg0: i32, %arg1: i32, %arg2: i32) -> (i32, i32, i32, i32) {
    %c0_i32 = arith.constant 0 : i32
    %c0_i32_0 = arith.constant 0 : i32
    %c0_i32_1 = arith.constant 0 : i32
    return %arg0, %arg2, %c0_i32, %c0_i32_0 : i32, i32, i32, i32
  }
  func.func @transform_1(%arg0: i32, %arg1: i32, %arg2: i32) -> (i32, i32) {
    %c0_i32 = arith.constant 0 : i32
    %c0_i32_0 = arith.constant 0 : i32
    return %c0_i32, %arg1 : i32, i32
  }
  func.func @transform_2(%arg0: i32, %arg1: i32, %arg2: i32) -> (i32, i32, i32, i32) {
    %c0_i32 = arith.constant 0 : i32
    %c0_i32_0 = arith.constant 0 : i32
    return %arg0, %arg2, %c0_i32, %arg1 : i32, i32, i32, i32
  }
}

</mosaic_0001>

<bundles_post_ra>
// kernel: tpu_custom_call.1
= control target key start
LH: loop header
LB: loop body
LE: loop exit
PB: predicated region body
PF: predicated region fallthrough
CT: control target
= control target key end

     0   :  { %7 = vsyncpa [#allocation3], 0  ;;  %s1271_s0 = inlined_call_operand.hbm [shape: bf16[2,16,16,128], index: 0, kind: input, shape index: {}]   ;;  %s1272_s1 = inlined_call_operand.hbm [shape: bf16[128,128], index: 1, kind: input, shape index: {}]   ;;  %s1273_s2 = inlined_call_operand.hbm [shape: f32[2,16,16,128], index: 2, kind: output, shape index: {}]  }
   0x1   :  { %9 = vsyncpa [#allocation3 + $0x1], 0 }
   0x2   :  { %10 = vsyncpa [#allocation6], 0 }
   0x3   :  { %11 = vsyncpa [#allocation4], 0 }
   0x4   :  { %13 = vsyncpa [#allocation4 + $0x1], 0  ;;  %s1062_s9 = smov 0   ;;  %s1064_s10 = smov 0  }
   0x5   :  { %s1066_s11 = smov 0   ;;  %s1068_s12 = smov 0  }
   0x6   :  { %s1070_s13 = smov 0   ;;  %s1072_s14 = smov 0  }
   0x7 LB: > { %s654_s15 = sadd.s32 4294967295, %s1040_s14   ;;  %s655_s16 = sadd.s32 4294967294, %s1040_s14   ;;  %s1040_s14 = sphi %s1072_s14, %s19_s14   ;;  %s1036_s13 = sphi %s1070_s13, %s1285_s13   ;;  %s1032_s12 = sphi %s1068_s12, %s1284_s12   ;;  %s1028_s11 = sphi %s1066_s11, %s1283_s11   ;;  %s1024_s10 = sphi %s1064_s10, %s1282_s10   ;;  %s1020_s9 = sphi %s1062_s9, %s1281_s9  }
   0x8   : > { %p60_p0 = scmp.ne.s32.totalorder %s1024_s10, %s1020_s9  ;;  %p1096_p1 = scmp.eq.s32.totalorder %s654_s15, 0 }
   0x9   : > { %p1100_p2 = scmp.eq.s32.totalorder %s654_s15, 1  ;;  %p120_p3 = scmp.eq.s32.totalorder %s655_s16, 1 }
   0xa   : > { %p1106_p4 = por %p1096_p1, %p60_p0  ;;  %p656_p5 = scmp.ge.s32.totalorder %s1040_s14, 1 }
   0xb   : > { %p1111_p6 = por %p120_p3, %p60_p0  ;;  %p127_p7 = scmp.lt.s32.totalorder %s1040_s14, 3 }
   0xc   : > { %s140_s23 = sshll.u32 %s1272_s1, 4  ;;  %s1042_s25 = smov [#allocation5]   ;;  %s141_s23 = int_to_ptr.hbm [resolvable:$true] %s140_s23 }
   0xd   : > { %p1119_p8 = pnand %p656_p5, %p127_p7  ;;  %s142_s26 = sshll.u32 %s1042_s25, 4  ;;  %s143_s26 = int_to_ptr.vmem [resolvable:$true] %s142_s26 }
   0xe   : > { %p658_p11 = scmp.ge.s32.totalorder %s1040_s14, 2  ;;  %s1043_s27 = smov 64  }
   0xf   : > { %p825_p9 = pneg %p1119_p8  ;;  %s1044_s28 = smov 4  }
  0x10   : > { %s38_s29 = sadd.s32 1, %s1036_s13  ;;  %s47_s30 = sadd.s32 1, %s1028_s11 }
  0x11   : > { %p826_p10 = pnand %p825_p9, %p1096_p1  ;;  %p40_p12 = scmp.ge.s32.totalorder %s38_s29, 2 }
  0x12   : > { %p54_p13 = scmp.ne.s32.totalorder %s1028_s11, %s1024_s10  ;;  %p55_p0 = scmp.eq.s32.totalorder %s1040_s14, 0 }
  0x13   : > { %828 = dma.hbm_to_vmem [thread:$0]  (!%p826_p10), %s141_s23, 1024, %s143_s26, [#allocation6], %s1043_s27, %s1043_s27, %s1044_s28  }
  0x14   : > { %s1287_s29 = smov (%p40_p12, %s38_s29), 0  ;;  %p1138_p3 = por %p55_p0, %p54_p13 }
  0x15   : > { %p1144_p5 = por %p1100_p2, %p54_p13  ;;  %s42_s5 = ssub.s32 %s1036_s13, %s1287_s29 }
  0x16   : > { %p838_p7 = scmp.lt.s32.totalorder %s1040_s14, 2  ;;  %p45_p9 = scmp.eq.s32.totalorder %s42_s5, 0 }
  0x17   : > { %s156_s6 = sand.u32 1, %s1028_s11   ;;  %s767_s15 = sshll.u32 %s1036_s13, 7 }
  0x18   : > { %s659_s7 = sshll.u32 %s156_s6, 7  ;;  %s168_s22 = scalar_lea.hbm %s1271_s0, %s767_s15 }
  0x19   : > { %s1153_s8 = scalar_select %p45_p9, %s1028_s11, %s47_s30  }
  0x1a   : > { %s160_s23 = scalar_lea.vmem [#allocation2], %s659_s7  ;;  %s169_s18 = sshll.u32 %s168_s22, 4  ;;  %s170_s18 = int_to_ptr.hbm [resolvable:$true] %s169_s18 }
  0x1b   : > { %s171_s25 = sshll.u32 %s160_s23, 4  ;;  %p830_p2 = pnand %p838_p7, %p1138_p3  ;;  %s172_s25 = int_to_ptr.vmem [resolvable:$true] %s171_s25 }
  0x1c   : > { %s157_s26 = scalar_lea.sflag [#allocation3], %s156_s6  ;;  %183 = sbr.rel (%p1119_p8) target bundleno = 262 (0x106), region = 28 }
  0x1d   : > { %832 = dma.hbm_to_vmem [thread:$0]  (!%p830_p2), %s170_s18, 2048, %s172_s25, %s157_s26, %s1043_s27, %s1043_s27, %s1044_s28  }
  0x1e   : > { %s1167_s30 = sand.u32 (!%p1119_p8), 1, %s1024_s10  }
  0x1f   : > { %s663_s5 = sshll.u32 (!%p1119_p8), %s1167_s30, 7  ;;  %s186_s7 = scalar_lea.sflag (!%p1119_p8), [#allocation3], %s1167_s30 }
  0x20   : > { %s1171_s15 = scalar_lea.vmem (!%p1119_p8), [#allocation2], %s663_s5 }
  0x21   : > { %1007 = dma.done.wait (%p1106_p4), %s186_s7, 2048  }
  0x22   : > { %1009 = vsyncadd (%p1106_p4), %s186_s7, 4294965248 }
  0x23   : > { %1011 = dma.done.wait (%p1096_p1), [#allocation6], 1024  }
  0x24   : > { %1013 = vsyncadd (%p1096_p1), [#allocation6], 4294966272  ;;  %v791_v0 = vld [vmem:[#allocation5 + $0x38] sm:$0xff]  ;;  %v790_v1 = vld [vmem:[#allocation5 + $0x30] sm:$0xff]  ;;  %s665_s17 = sshll.u32 %s1167_s30, 8  ;;  %s792_s24 = sshll.u32 %s1032_s12, 8 }
  0x25   : > { %410 = vmatpush.bf16.msra.mxu0 %v791_v0  ;;  %793 = vmatpush.bf16.msra.mxu1 %v791_v0  ;;  %v789_v2 = vld [vmem:[#allocation5 + $0x28] sm:$0xff]  ;;  %v788_v3 = vld [vmem:[#allocation5 + $0x20] sm:$0xff]  ;;  %v787_v4 = vld [vmem:[#allocation5 + $0x18] sm:$0xff]  ;;  %s1198_s19 = scalar_lea.vmem [#allocation7], %s665_s17  ;;  %s547_s3 = scalar_lea.hbm %s1273_s2, %s792_s24 }
  0x26   : > { %794 = vmatpush.bf16.msra.mxu2 %v791_v0  ;;  %795 = vmatpush.bf16.msra.mxu3 %v791_v0  ;;  %v786_v5 = vld [vmem:[#allocation5 + $0x10] sm:$0xff]  ;;  %v785_v6 = vld [vmem:[#allocation5 + $0x8] sm:$0xff]  ;;  %v784_v7 = vld [vmem:[#allocation5] sm:$0xff]  ;;  %s548_s6 = sshll.u32 %s1198_s19, 4  ;;  %s550_s16 = sshll.u32 %s547_s3, 4  ;;  %s549_s6 = int_to_ptr.vmem [resolvable:$true] %s548_s6  ;;  %s551_s16 = int_to_ptr.hbm [resolvable:$true] %s550_s16 }
  0x27   : > { %v768_v8 = vld [vmem:[%s1171_s15] sm:$0xff]  ;;  %v769_v12 = vld [vmem:[%s1171_s15 + $0x8] sm:$0xff]  ;;  %v770_v16 = vld [vmem:[%s1171_s15 + $0x10] sm:$0xff]  ;;  %s532_s12 = scalar_lea.sflag [#allocation4], %s1167_s30  ;;  %s968_s21 = sshra.s32 %s551_s16, 4  ;;  %s969_s21 = int_to_ptr.hbm [resolvable:$true] %s968_s21 }
  0x28   : > { %v772_v9 = vld [vmem:[%s1171_s15 + $0x20] sm:$0xff]  ;;  %v773_v13 = vld [vmem:[%s1171_s15 + $0x28] sm:$0xff]  ;;  %v774_v17 = vld [vmem:[%s1171_s15 + $0x30] sm:$0xff]  ;;  %s970_s22 = scalar_lea.hbm %s969_s21, 256  ;;  %s974_s18 = scalar_lea.hbm %s1273_s2, 512 }
  0x29   : > { %411 = vmatpush.bf16.msra.mxu0 %v790_v1  ;;  %796 = vmatpush.bf16.msra.mxu1 %v790_v1  ;;  %v776_v10 = vld [vmem:[%s1171_s15 + $0x40] sm:$0xff]  ;;  %v777_v14 = vld [vmem:[%s1171_s15 + $0x48] sm:$0xff]  ;;  %v778_v18 = vld [vmem:[%s1171_s15 + $0x50] sm:$0xff]  ;;  %p971_p1 = scmp.ne.s32.totalorder %s969_s21, %s970_s22  ;;  %p975_p10 = scmp.lt.s32.totalorder %s969_s21, %s1273_s2 }
  0x2a   : > { %797 = vmatpush.bf16.msra.mxu2 %v790_v1  ;;  %798 = vmatpush.bf16.msra.mxu3 %v790_v1  ;;  %v780_v11 = vld [vmem:[%s1171_s15 + $0x60] sm:$0xff]  ;;  %v781_v15 = vld [vmem:[%s1171_s15 + $0x68] sm:$0xff]  ;;  %v782_v19 = vld [vmem:[%s1171_s15 + $0x70] sm:$0xff]  ;;  %p976_p12 = scmp.lt.s32.totalorder %s974_s18, %s970_s22 }
  0x2b   : > { %v771_v20 = vld [vmem:[%s1171_s15 + $0x18] sm:$0xff]  ;;  %p972_p4 = pnand %p971_p1, %p1144_p5 }
  0x2c   : > { %v775_v21 = vld [vmem:[%s1171_s15 + $0x38] sm:$0xff]  ;;  %p977_p13 = por %p976_p12, %p975_p10 }
  0x2d   : > { %412 = vmatpush.bf16.msra.mxu0 %v789_v2  ;;  %799 = vmatpush.bf16.msra.mxu1 %v789_v2  ;;  %v779_v22 = vld [vmem:[%s1171_s15 + $0x58] sm:$0xff]  ;;  %p973_p8 = pneg %p972_p4 }
  0x2e   : > { %800 = vmatpush.bf16.msra.mxu2 %v789_v2  ;;  %801 = vmatpush.bf16.msra.mxu3 %v789_v2  ;;  %v783_v23 = vld [vmem:[%s1171_s15 + $0x78] sm:$0xff] }
  0x2f   : > { %p978_p0 = pnand %p977_p13, %p973_p8 }
  0x31   : > { %413 = vmatpush.bf16.msra.mxu0 %v788_v3  ;;  %802 = vmatpush.bf16.msra.mxu1 %v788_v3 }
  0x32   : > { %803 = vmatpush.bf16.msra.mxu2 %v788_v3  ;;  %804 = vmatpush.bf16.msra.mxu3 %v788_v3 }
  0x35   : > { %414 = vmatpush.bf16.msra.mxu0 %v787_v4  ;;  %805 = vmatpush.bf16.msra.mxu1 %v787_v4 }
  0x36   : > { %806 = vmatpush.bf16.msra.mxu2 %v787_v4  ;;  %807 = vmatpush.bf16.msra.mxu3 %v787_v4 }
  0x39   : > { %415 = vmatpush.bf16.msra.mxu0 %v786_v5  ;;  %808 = vmatpush.bf16.msra.mxu1 %v786_v5 }
  0x3a   : > { %809 = vmatpush.bf16.msra.mxu2 %v786_v5  ;;  %810 = vmatpush.bf16.msra.mxu3 %v786_v5 }
  0x3d   : > { %416 = vmatpush.bf16.msra.mxu0 %v785_v6  ;;  %811 = vmatpush.bf16.msra.mxu1 %v785_v6 }
  0x3e   : > { %812 = vmatpush.bf16.msra.mxu2 %v785_v6  ;;  %813 = vmatpush.bf16.msra.mxu3 %v785_v6 }
  0x41   : > { %417 = vmatpush.bf16.msra.mxu0 %v784_v7  ;;  %814 = vmatpush.bf16.msra.mxu1 %v784_v7 }
  0x42   : > { %815 = vmatpush.bf16.msra.mxu2 %v784_v7  ;;  %816 = vmatpush.bf16.msra.mxu3 %v784_v7 }
  0x44   : > { %418 = vmatmul.bf16.vlgmr.msra.gmra.mxu0 %v768_v8  ;;  %438 = vmatmul.bf16.vlgmr.msra.gmra.mxu1 %v772_v9 }
  0x45   : > { %458 = vmatmul.bf16.vlgmr.msra.gmra.mxu2 %v776_v10  ;;  %478 = vmatmul.bf16.vlgmr.msra.gmra.mxu3 %v780_v11 }
  0x54   : > { %423 = vmatmul.bf16.gmra.mxu0 %v769_v12  ;;  %443 = vmatmul.bf16.gmra.mxu1 %v773_v13 }
  0x55   : > { %463 = vmatmul.bf16.gmra.mxu2 %v777_v14  ;;  %483 = vmatmul.bf16.gmra.mxu3 %v781_v15 }
  0x64   : > { %428 = vmatmul.bf16.gmra.mxu0 %v770_v16  ;;  %448 = vmatmul.bf16.gmra.mxu1 %v774_v17 }
  0x65   : > { %468 = vmatmul.bf16.gmra.mxu2 %v778_v18  ;;  %488 = vmatmul.bf16.gmra.mxu3 %v782_v19 }
  0x74   : > { %433 = vmatmul.bf16.gmra.mxu0 %v771_v20  ;;  %453 = vmatmul.bf16.gmra.mxu1 %v775_v21 }
  0x75   : > { %473 = vmatmul.bf16.gmra.mxu2 %v779_v22  ;;  %493 = vmatmul.bf16.gmra.mxu3 %v783_v23 }
  0xc1   : > { %v419_v24 = vpop.f32.mrf.mxu0  ;;  %v439_v25 = vpop.f32.mrf.mxu1 }
  0xc2   : > { %499 = vst [vmem:[%s1198_s19] sm:$0xff] %v419_v24 }
  0xc3   : > { %507 = vst [vmem:[%s1198_s19 + $0x40] sm:$0xff] %v439_v25 }
  0xc8   : > { %v459_v26 = vpop.f32.mrf.mxu2  ;;  %v479_v27 = vpop.f32.mrf.mxu3 }
  0xc9   : > { %515 = vst [vmem:[%s1198_s19 + $0x80] sm:$0xff] %v459_v26  ;;  %v421_v28 = vpop.f32.mrf.mxu0  ;;  %v441_v29 = vpop.f32.mrf.mxu1 }
  0xca   : > { %523 = vst [vmem:[%s1198_s19 + $0xc0] sm:$0xff] %v479_v27 }
  0xcb   : > { %500 = vst [vmem:[%s1198_s19 + $0x8] sm:$0xff] %v421_v28 }
  0xcc   : > { %508 = vst [vmem:[%s1198_s19 + $0x48] sm:$0xff] %v441_v29 }
  0xd0   : > { %v461_v30 = vpop.f32.mrf.mxu2  ;;  %v481_v31 = vpop.f32.mrf.mxu3 }
  0xd1   : > { %516 = vst [vmem:[%s1198_s19 + $0x88] sm:$0xff] %v461_v30  ;;  %v424_v32 = vpop.f32.mrf.mxu0  ;;  %v444_v33 = vpop.f32.mrf.mxu1 }
  0xd2   : > { %524 = vst [vmem:[%s1198_s19 + $0xc8] sm:$0xff] %v481_v31 }
  0xd3   : > { %501 = vst [vmem:[%s1198_s19 + $0x10] sm:$0xff] %v424_v32 }
  0xd4   : > { %509 = vst [vmem:[%s1198_s19 + $0x50] sm:$0xff] %v444_v33 }
  0xd8   : > { %v464_v34 = vpop.f32.mrf.mxu2  ;;  %v484_v35 = vpop.f32.mrf.mxu3 }
  0xd9   : > { %517 = vst [vmem:[%s1198_s19 + $0x90] sm:$0xff] %v464_v34  ;;  %v426_v36 = vpop.f32.mrf.mxu0  ;;  %v446_v37 = vpop.f32.mrf.mxu1 }
  0xda   : > { %525 = vst [vmem:[%s1198_s19 + $0xd0] sm:$0xff] %v484_v35 }
  0xdb   : > { %502 = vst [vmem:[%s1198_s19 + $0x18] sm:$0xff] %v426_v36 }
  0xdc   : > { %510 = vst [vmem:[%s1198_s19 + $0x58] sm:$0xff] %v446_v37 }
  0xe0   : > { %v466_v38 = vpop.f32.mrf.mxu2  ;;  %v486_v39 = vpop.f32.mrf.mxu3 }
  0xe1   : > { %518 = vst [vmem:[%s1198_s19 + $0x98] sm:$0xff] %v466_v38  ;;  %v429_v40 = vpop.f32.mrf.mxu0  ;;  %v449_v41 = vpop.f32.mrf.mxu1 }
  0xe2   : > { %526 = vst [vmem:[%s1198_s19 + $0xd8] sm:$0xff] %v486_v39 }
  0xe3   : > { %503 = vst [vmem:[%s1198_s19 + $0x20] sm:$0xff] %v429_v40 }
  0xe4   : > { %511 = vst [vmem:[%s1198_s19 + $0x60] sm:$0xff] %v449_v41 }
  0xe8   : > { %v469_v42 = vpop.f32.mrf.mxu2  ;;  %v489_v43 = vpop.f32.mrf.mxu3 }
  0xe9   : > { %519 = vst [vmem:[%s1198_s19 + $0xa0] sm:$0xff] %v469_v42  ;;  %v431_v44 = vpop.f32.mrf.mxu0  ;;  %v451_v45 = vpop.f32.mrf.mxu1 }
  0xea   : > { %527 = vst [vmem:[%s1198_s19 + $0xe0] sm:$0xff] %v489_v43 }
  0xeb   : > { %504 = vst [vmem:[%s1198_s19 + $0x28] sm:$0xff] %v431_v44 }
  0xec   : > { %512 = vst [vmem:[%s1198_s19 + $0x68] sm:$0xff] %v451_v45 }
  0xf0   : > { %v471_v46 = vpop.f32.mrf.mxu2  ;;  %v491_v47 = vpop.f32.mrf.mxu3 }
  0xf1   : > { %520 = vst [vmem:[%s1198_s19 + $0xa8] sm:$0xff] %v471_v46  ;;  %v434_v48 = vpop.f32.mrf.mxu0  ;;  %v454_v49 = vpop.f32.mrf.mxu1 }
  0xf2   : > { %528 = vst [vmem:[%s1198_s19 + $0xe8] sm:$0xff] %v491_v47 }
  0xf3   : > { %505 = vst [vmem:[%s1198_s19 + $0x30] sm:$0xff] %v434_v48 }
  0xf4   : > { %513 = vst [vmem:[%s1198_s19 + $0x70] sm:$0xff] %v454_v49 }
  0xf8   : > { %v474_v50 = vpop.f32.mrf.mxu2  ;;  %v494_v51 = vpop.f32.mrf.mxu3 }
  0xf9   : > { %521 = vst [vmem:[%s1198_s19 + $0xb0] sm:$0xff] %v474_v50  ;;  %v436_v52 = vpop.f32.mrf.mxu0  ;;  %v456_v53 = vpop.f32.mrf.mxu1 }
  0xfa   : > { %529 = vst [vmem:[%s1198_s19 + $0xf0] sm:$0xff] %v494_v51 }
  0xfb   : > { %506 = vst [vmem:[%s1198_s19 + $0x38] sm:$0xff] %v436_v52 }
  0xfc   : > { %514 = vst [vmem:[%s1198_s19 + $0x78] sm:$0xff] %v456_v53 }
 0x100   : > { %v476_v54 = vpop.f32.mrf.mxu2  ;;  %v496_v55 = vpop.f32.mrf.mxu3 }
 0x101   : > { %522 = vst [vmem:[%s1198_s19 + $0xb8] sm:$0xff] %v476_v54 }
 0x102   : > { %530 = vst [vmem:[%s1198_s19 + $0xf8] sm:$0xff] %v496_v55 }
 0x103   : > { %981 = shalt.err (!%p978_p0)
}
 0x104   : > { %s1045_s30 = smov 128   ;;  %s1046_s7 = smov 8  }
 0x105   : > { %823 = dma.vmem_to_hbm [thread:$0]  (%p1144_p5), %s549_s6, 4096, %s551_s16, %s532_s12, %s1045_s30, %s1045_s30, %s1046_s7  }
 0x106 PF: > { %s565_s15 = sand.u32 1, %s1020_s9   ;;  %p834_p3 = pnand %p658_p11, %p1111_p6 }
 0x107   : > { %s566_s17 = scalar_lea.sflag [#allocation4], %s565_s15 }
 0x108   : > { %p835_p7 = pneg %p834_p3 }
 0x10a   : > { %1015 = dma.done.wait (%p835_p7), %s566_s17, 4096  }
 0x10b   : > { %1017 = vsyncadd (%p835_p7), %s566_s17, 4294963200  ;;  %s19_s14 = sadd.s32 1, %s1040_s14   ;;  %s1281_s9 = smov %s1024_s10 }
 0x10c   : > { %p16_p9 = scmp.ge.s32.totalorder %s19_s14, 4   ;;  %s1282_s10 = smov %s1028_s11 }
 0x10d   : > { %s1283_s11 = smov %s1153_s8  ;;  %s1284_s12 = smov %s1036_s13 }
 0x10e   : > { %s1285_s13 = smov %s1287_s29  ;;  %18 = sbr.rel (!%p16_p9) target bundleno = 7 (0x7), region = 78 }
 0x113   :  { %572 = vsyncpa [#allocation3], 1 }
 0x114   :  { %574 = vsyncpa [#allocation3 + $0x1], 1 }
 0x115   :  { %575 = vsyncpa [#allocation6], 1 }
 0x116   :  { %576 = vsyncpa [#allocation4], 1 }
 0x117   :  { %578 = vsyncpa [#allocation4 + $0x1], 1 }

</bundles_post_ra>
